<compile_context>
chip_gen: v7x
topology: tpu7x:2x2x1
jax: 0.10.0
libtpu: 0.0.40
codegen_flags: <defaults>
</compile_context>

<pallas_src>
import math

import jax
import jax.numpy as jnp
from jax.experimental import pallas as pl
from jax.experimental.pallas import tpu as pltpu

_LANE = 128


def _pointrend_kernel(coords_ref, img_ref,
                      g0_ref, g1_ref,
                      w1_ref, b1_ref,
                      w2_ref, b2_ref,
                      w3_ref, b3_ref,
                      out_ref, feat_ref):
    # coords_ref: (2, TP) f32       img_ref: (C_img, TP) cdtype
    # feat_ref:   (channels + C_img, TP) cdtype  (VMEM scratch)
    # out_ref:    (num_classes, TP) f32
    half = g0_ref.shape[0]
    channels = 2 * half
    cdtype = feat_ref.dtype

    # --- positional encoding on (half, TP): 2 broadcast FMAs + sin/cos -------
    xy = 2.0 * coords_ref[...] - 1.0                              # (2, TP) f32
    arg = g0_ref[...] * xy[0:1, :] + g1_ref[...] * xy[1:2, :]     # (half, TP)

    # --- build the fused layer-0 operand [sin; cos; img] in VMEM scratch -----
    feat_ref[0:half, :] = jnp.sin(arg).astype(cdtype)
    feat_ref[half:channels, :] = jnp.cos(arg).astype(cdtype)
    feat_ref[channels:, :] = img_ref[...].astype(cdtype)

    # --- layer 0: single fused Linear(in_total -> channels) + ReLU -----------
    h = (jnp.dot(w1_ref[...], feat_ref[...],
                 preferred_element_type=jnp.float32) + b1_ref[...])
    h = jnp.maximum(h, 0.0)

    # --- layer 1: Linear(channels -> channels) + ReLU ------------------------
    h = (jnp.dot(w2_ref[...], h.astype(cdtype),
                 preferred_element_type=jnp.float32) + b2_ref[...])
    h = jnp.maximum(h, 0.0)

    # --- layer 2: final Linear(channels -> num_classes), lane-dense store ----
    out_ref[...] = (jnp.dot(w3_ref[...], h.astype(cdtype),
                            preferred_element_type=jnp.float32)
                    + b3_ref[...]).astype(out_ref.dtype)


def simplified_point_rend(fine_grained_features, point_coords, params, *,
                          channels, num_classes=1, tile_p=1024,
                          use_bf16=False):
    """JAX/Pallas equivalent of SimplifiedPointRend.forward (eval mode).

    fine_grained_features: (B, C_img, P) float32   (PyTorch NCL layout)
    point_coords:          (B, P, 2) float32, values in [0, 1]
    returns:               (B, num_classes, P) float32
    """
    B, C_img, P = fine_grained_features.shape
    if B == 0 or P == 0:
        # num_instances == 0 early-return branch (static shape check).
        return jnp.zeros((B, num_classes, P), dtype=jnp.float32)

    half = channels // 2
    cdtype = jnp.bfloat16 if use_bf16 else jnp.float32
    csize = jnp.dtype(cdtype).itemsize

    # ----- point-tile selection (non-collapsing) -----------------------------
    tp = max(_LANE, (int(tile_p) // _LANE) * _LANE)
    P_lane = -(-P // _LANE) * _LANE
    tp = min(tp, P_lane)
    # v7x has 2 TensorCores: when B == 1, keep at least 2 grid steps.
    if B == 1 and P_lane >= 2 * _LANE:
        tp = min(tp, max(_LANE, (P_lane // 2 // _LANE) * _LANE))
    # VMEM budget cap (double-buffered inputs/outputs + scratch + f32 temps);
    # keeps us well under v7x's 32 MiB default scoped limit / 64 MiB physical.
    bytes_per_col = (2 * 2 * 4                      # coords, double-buffered
                     + 2 * C_img * csize            # image feats, double-buffered
                     + 2 * num_classes * 4          # output, double-buffered
                     + (channels + C_img) * csize   # feat scratch
                     + 4 * channels * 4)            # f32 intermediates slack
    vmem_budget = 16 * 1024 * 1024
    max_tp = max(_LANE, (vmem_budget // bytes_per_col // _LANE) * _LANE)
    tp = min(tp, max_tp)

    P_pad = -(-P // tp) * tp
    grid = (B, P_pad // tp)

    # ----- input prep (tiny coord transpose; fold pad into dtype cast) -------
    coords_t = jnp.transpose(point_coords, (0, 2, 1)).astype(jnp.float32)  # (B,2,P)
    img = fine_grained_features
    if P_pad != P:
        pad = P_pad - P
        coords_t = jnp.pad(coords_t, ((0, 0), (0, 0), (0, pad)))
        # TODO(synk): a masked last tile would avoid this copy entirely for
        # the f32 path; with bf16 the pad fuses into the cast below anyway.
        img = jnp.pad(img, ((0, 0), (0, 0), (0, pad)))
    img = img.astype(cdtype)

    # ----- kernel-layout (transposed / fused) weights ------------------------
    two_pi = 2.0 * math.pi
    g0 = (two_pi * params["gauss"][0]).reshape(half, 1).astype(jnp.float32)
    g1 = (two_pi * params["gauss"][1]).reshape(half, 1).astype(jnp.float32)
    # fused layer-0 weight: (channels, channels + C_img)
    w1 = jnp.concatenate([params["w1_sin"], params["w1_cos"], params["w1_img"]],
                         axis=0).T.astype(cdtype)
    b1 = params["b1"].reshape(channels, 1).astype(jnp.float32)
    w2 = params["w2"].T.astype(cdtype)                       # (channels, channels)
    b2 = params["b2"].reshape(channels, 1).astype(jnp.float32)
    w3 = params["w3"].T.astype(cdtype)                       # (num_classes, channels)
    b3 = params["b3"].reshape(num_classes, 1).astype(jnp.float32)

    # ----- cost estimate hint for the XLA scheduler ---------------------------
    flops = int(2 * B * P_pad * channels
                * ((channels + C_img) + channels + num_classes))
    transcendentals = int(B * P_pad * channels)
    bytes_accessed = int(coords_t.size * 4 + img.size * csize
                         + B * num_classes * P_pad * 4
                         + (w1.size + w2.size + w3.size) * csize)
    cost = pl.CostEstimate(flops=flops, transcendentals=transcendentals,
                           bytes_accessed=bytes_accessed)

    full2d = lambda shp: pl.BlockSpec(shp, lambda b, j: (0, 0))

    out = pl.pallas_call(
        _pointrend_kernel,
        out_shape=jax.ShapeDtypeStruct((B, num_classes, P_pad), jnp.float32),
        grid=grid,
        in_specs=[
            pl.BlockSpec((None, 2, tp), lambda b, j: (b, 0, j)),       # coords
            pl.BlockSpec((None, C_img, tp), lambda b, j: (b, 0, j)),   # image feats
            full2d((half, 1)),                                         # g0
            full2d((half, 1)),                                         # g1
            full2d((channels, channels + C_img)),                      # W1 fused
            full2d((channels, 1)),                                     # b1
            full2d((channels, channels)),                              # W2
            full2d((channels, 1)),                                     # b2
            full2d((num_classes, channels)),                           # W3
            full2d((num_classes, 1)),                                  # b3
        ],
        out_specs=pl.BlockSpec((None, num_classes, tp), lambda b, j: (b, 0, j)),
        scratch_shapes=[pltpu.VMEM((channels + C_img, tp), cdtype)],
        compiler_params=pltpu.CompilerParams(
            dimension_semantics=("parallel", "parallel")),
        cost_estimate=cost,
    )(coords_t, img, g0, g1, w1, b1, w2, b2, w3, b3)

    if P_pad != P:
        out = out[:, :, :P]
    return out


def reference_forward(fine_grained_features, point_coords, params, *,
                      channels, num_classes=1):
    """Pure-JAX transcription of the PyTorch forward (eval mode) for checking."""
    B, C_img, P = fine_grained_features.shape
    N = B * P
    loc = 2.0 * point_coords.reshape(N, 2) - 1.0
    loc = loc @ params["gauss"]
    loc = 2.0 * math.pi * loc
    loc = jnp.concatenate([jnp.sin(loc), jnp.cos(loc)], axis=1)         # (N, channels)
    loc = jnp.transpose(loc.reshape(B, P, channels), (0, 2, 1))         # (B, channels, P)
    feat = jnp.concatenate([loc, fine_grained_features], axis=1)        # (B, in_total, P)
    x = jnp.transpose(feat, (0, 2, 1)).reshape(N, -1)                   # (N, in_total)

    w1 = jnp.concatenate([params["w1_sin"], params["w1_cos"], params["w1_img"]], axis=0)
    h = jnp.maximum(x @ w1 + params["b1"], 0.0)
    h = jnp.maximum(h @ params["w2"] + params["b2"], 0.0)
    out = h @ params["w3"] + params["b3"]
    return jnp.transpose(out.reshape(B, P, num_classes), (0, 2, 1))


def make_params(key, *, in_channels_img, channels, num_classes=1):
    """Deterministic synthetic parameters (module __init__ shapes, row layout x@W+b)."""
    half = channels // 2
    ks = jax.random.split(key, 8)
    scale_in = 1.0 / math.sqrt(channels + in_channels_img)
    scale_h = 1.0 / math.sqrt(channels)
    return {
        # registered buffer: torch.randn((2, channels // 2))
        "gauss": jax.random.normal(ks[0], (2, half), jnp.float32),
        # layer 0: Linear(in_total=channels+in_channels_img -> channels), split by input block
        "w1_sin": jax.random.normal(ks[1], (half, channels), jnp.float32) * scale_in,
        "w1_cos": jax.random.normal(ks[2], (half, channels), jnp.float32) * scale_in,
        "w1_img": jax.random.normal(ks[3], (in_channels_img, channels), jnp.float32) * scale_in,
        "b1": jax.random.normal(ks[4], (1, channels), jnp.float32) * scale_in,
        # layer 1: Linear(channels -> channels)
        "w2": jax.random.normal(ks[5], (channels, channels), jnp.float32) * scale_h,
        "b2": jnp.zeros((1, channels), jnp.float32),
        # layer 2: Linear(channels -> num_classes)
        "w3": jax.random.normal(ks[6], (channels, num_classes), jnp.float32) * scale_h,
        "b3": jnp.zeros((1, num_classes), jnp.float32),
    }


if __name__ == "__main__":
    # Config: in_channels=4, num_layers=2 (-> 3 linear layers total), channels=32,
    # image_feature_enabled=True, positional_encoding_enabled=True, num_classes=1.
    # TODO(synk): image_feature_enabled=False / positional_encoding_enabled=False
    # configurations are not implemented in the kernel (test config has both on).
    B, C_IMG, P = 2, 4, 256
    CHANNELS, NUM_CLASSES = 32, 1

    key = jax.random.PRNGKey(0)
    k_feat, k_coord, k_param = jax.random.split(key, 3)

    fine_grained_features = jax.random.normal(k_feat, (B, C_IMG, P), jnp.float32)
    point_coords = jax.random.uniform(k_coord, (B, P, 2), jnp.float32)
    params = make_params(k_param, in_channels_img=C_IMG,
                         channels=CHANNELS, num_classes=NUM_CLASSES)

    ref = reference_forward(fine_grained_features, point_coords, params,
                            channels=CHANNELS, num_classes=NUM_CLASSES)

    # f32 path (strict check)
    out = simplified_point_rend(fine_grained_features, point_coords, params,
                                channels=CHANNELS, num_classes=NUM_CLASSES,
                                use_bf16=False)
    out = jax.block_until_ready(out)
    assert out.shape == (B, NUM_CLASSES, P), out.shape
    assert jnp.allclose(out, ref, rtol=1e-4, atol=1e-4), \
        float(jnp.max(jnp.abs(out - ref)))

    # bf16 operand path (f32 accumulation) for v6e/v7x — loose tolerance
    out_bf16 = simplified_point_rend(fine_grained_features, point_coords, params,
                                     channels=CHANNELS, num_classes=NUM_CLASSES,
                                     use_bf16=True)
    out_bf16 = jax.block_until_ready(out_bf16)
    assert out_bf16.shape == (B, NUM_CLASSES, P), out_bf16.shape
    assert jnp.allclose(out_bf16, ref, rtol=5e-2, atol=1e-1), \
        float(jnp.max(jnp.abs(out_bf16 - ref)))

    print("KERNEL_OK")
</pallas_src>

<mosaic_0001>
module attributes {stable_mosaic.version = 11 : i64} {
  func.func @_pointrend_kernel(%arg0: i32, %arg1: i32, %arg2: memref<1x2x256xf32, #tpu.memory_space<vmem>>, %arg3: memref<1x4x256xf32, #tpu.memory_space<vmem>>, %arg4: memref<16x1xf32, #tpu.memory_space<vmem>>, %arg5: memref<16x1xf32, #tpu.memory_space<vmem>>, %arg6: memref<32x36xf32, #tpu.memory_space<vmem>>, %arg7: memref<32x1xf32, #tpu.memory_space<vmem>>, %arg8: memref<32x32xf32, #tpu.memory_space<vmem>>, %arg9: memref<32x1xf32, #tpu.memory_space<vmem>>, %arg10: memref<1x32xf32, #tpu.memory_space<vmem>>, %arg11: memref<1x1xf32, #tpu.memory_space<vmem>>, %arg12: memref<1x1x256xf32, #tpu.memory_space<vmem>>, %arg13: memref<36x256xf32, #tpu.memory_space<vmem>>) attributes {dimension_semantics = [#tpu.dimension_semantics<parallel>, #tpu.dimension_semantics<parallel>], iteration_bounds = array<i64: 2, 1>, scalar_prefetch = 0 : i64, scratch_operands = 1 : i64, tpu.core_type = #tpu.core_type<tc>, window_params = [{transform_indices = @transform_0, window_bounds = array<i64: 1, 2, 256>}, {transform_indices = @transform_1, window_bounds = array<i64: 1, 4, 256>}, {pipeline_mode = #tpu.pipeline_mode<synchronous>, transform_indices = @transform_2, window_bounds = array<i64: 16, 1>}, {pipeline_mode = #tpu.pipeline_mode<synchronous>, transform_indices = @transform_3, window_bounds = array<i64: 16, 1>}, {pipeline_mode = #tpu.pipeline_mode<synchronous>, transform_indices = @transform_4, window_bounds = array<i64: 32, 36>}, {pipeline_mode = #tpu.pipeline_mode<synchronous>, transform_indices = @transform_5, window_bounds = array<i64: 32, 1>}, {pipeline_mode = #tpu.pipeline_mode<synchronous>, transform_indices = @transform_6, window_bounds = array<i64: 32, 32>}, {pipeline_mode = #tpu.pipeline_mode<synchronous>, transform_indices = @transform_7, window_bounds = array<i64: 32, 1>}, {pipeline_mode = #tpu.pipeline_mode<synchronous>, transform_indices = @transform_8, window_bounds = array<i64: 1, 32>}, {pipeline_mode = #tpu.pipeline_mode<synchronous>, transform_indices = @transform_9, window_bounds = array<i64: 1, 1>}, {transform_indices = @transform_10, window_bounds = array<i64: 1, 1, 256>}]} {
    %c0 = arith.constant 0 : index
    %c0_0 = arith.constant 0 : index
    %c0_1 = arith.constant 0 : index
    %0 = vector.load %arg2[%c0, %c0_0, %c0_1] : memref<1x2x256xf32, #tpu.memory_space<vmem>>, vector<1x2x256xf32>
    %1 = vector.shape_cast %0 : vector<1x2x256xf32> to vector<2x256xf32>
    %cst = arith.constant 2.000000e+00 : f32
    %2 = vector.broadcast %cst : f32 to vector<2x256xf32>
    %3 = arith.mulf %2, %1 : vector<2x256xf32>
    %cst_2 = arith.constant 1.000000e+00 : f32
    %4 = vector.broadcast %cst_2 : f32 to vector<2x256xf32>
    %5 = arith.subf %3, %4 : vector<2x256xf32>
    %c0_3 = arith.constant 0 : index
    %c0_4 = arith.constant 0 : index
    %6 = vector.load %arg4[%c0_3, %c0_4] : memref<16x1xf32, #tpu.memory_space<vmem>>, vector<16x1xf32>
    %7 = vector.extract_strided_slice %5 {offsets = [0, 0], sizes = [1, 256], strides = [1, 1]} : vector<2x256xf32> to vector<1x256xf32>
    %8 = vector.broadcast %6 : vector<16x1xf32> to vector<16x256xf32>
    %9 = vector.broadcast %7 : vector<1x256xf32> to vector<16x256xf32>
    %10 = arith.mulf %8, %9 : vector<16x256xf32>
    %c0_5 = arith.constant 0 : index
    %c0_6 = arith.constant 0 : index
    %11 = vector.load %arg5[%c0_5, %c0_6] : memref<16x1xf32, #tpu.memory_space<vmem>>, vector<16x1xf32>
    %12 = vector.extract_strided_slice %5 {offsets = [1, 0], sizes = [1, 256], strides = [1, 1]} : vector<2x256xf32> to vector<1x256xf32>
    %13 = vector.broadcast %11 : vector<16x1xf32> to vector<16x256xf32>
    %14 = vector.broadcast %12 : vector<1x256xf32> to vector<16x256xf32>
    %15 = arith.mulf %13, %14 : vector<16x256xf32>
    %16 = arith.addf %10, %15 : vector<16x256xf32>
    %17 = math.sin %16 : vector<16x256xf32>
    %c0_7 = arith.constant 0 : index
    %c0_8 = arith.constant 0 : index
    %18 = vector.load %arg13[%c0_7, %c0_8] : memref<36x256xf32, #tpu.memory_space<vmem>>, vector<16x256xf32>
    tpu.vector_store %arg13[%c0_7, %c0_8], %17 {strides = array<i32>} : memref<36x256xf32, #tpu.memory_space<vmem>>, vector<16x256xf32>,
    %19 = math.cos %16 : vector<16x256xf32>
    %c16 = arith.constant 16 : index
    %c0_9 = arith.constant 0 : index
    %20 = vector.load %arg13[%c16, %c0_9] : memref<36x256xf32, #tpu.memory_space<vmem>>, vector<16x256xf32>
    tpu.vector_store %arg13[%c16, %c0_9], %19 {strides = array<i32>} : memref<36x256xf32, #tpu.memory_space<vmem>>, vector<16x256xf32>,
    %c0_10 = arith.constant 0 : index
    %c0_11 = arith.constant 0 : index
    %c0_12 = arith.constant 0 : index
    %21 = vector.load %arg3[%c0_10, %c0_11, %c0_12] : memref<1x4x256xf32, #tpu.memory_space<vmem>>, vector<1x4x256xf32>
    %22 = vector.shape_cast %21 : vector<1x4x256xf32> to vector<4x256xf32>
    %c32 = arith.constant 32 : index
    %c0_13 = arith.constant 0 : index
    %23 = vector.load %arg13[%c32, %c0_13] : memref<36x256xf32, #tpu.memory_space<vmem>>, vector<4x256xf32>
    tpu.vector_store %arg13[%c32, %c0_13], %22 {strides = array<i32>} : memref<36x256xf32, #tpu.memory_space<vmem>>, vector<4x256xf32>,
    %c0_14 = arith.constant 0 : index
    %c0_15 = arith.constant 0 : index
    %24 = vector.load %arg6[%c0_14, %c0_15] : memref<32x36xf32, #tpu.memory_space<vmem>>, vector<32x36xf32>
    %c0_16 = arith.constant 0 : index
    %c0_17 = arith.constant 0 : index
    %25 = vector.load %arg13[%c0_16, %c0_17] : memref<36x256xf32, #tpu.memory_space<vmem>>, vector<36x256xf32>
    %cst_18 = arith.constant dense<0.000000e+00> : vector<32x256xf32>
    %26 = tpu.matmul %24, %25, %cst_18 {dimension_numbers = #tpu.dot_dimension_numbers<[1], [0], [0], [1], [0, 0, 1, 1], [], []>} : vector<32x36xf32>, vector<36x256xf32>, vector<32x256xf32> -> vector<32x256xf32>
    %c0_19 = arith.constant 0 : index
    %c0_20 = arith.constant 0 : index
    %27 = vector.load %arg7[%c0_19, %c0_20] : memref<32x1xf32, #tpu.memory_space<vmem>>, vector<32x1xf32>
    %28 = vector.broadcast %27 : vector<32x1xf32> to vector<32x256xf32>
    %29 = arith.addf %26, %28 : vector<32x256xf32>
    %cst_21 = arith.constant 0.000000e+00 : f32
    %30 = vector.broadcast %cst_21 : f32 to vector<32x256xf32>
    %31 = arith.maximumf %29, %30 : vector<32x256xf32>
    %c0_22 = arith.constant 0 : index
    %c0_23 = arith.constant 0 : index
    %32 = vector.load %arg8[%c0_22, %c0_23] : memref<32x32xf32, #tpu.memory_space<vmem>>, vector<32x32xf32>
    %cst_24 = arith.constant dense<0.000000e+00> : vector<32x256xf32>
    %33 = tpu.matmul %32, %31, %cst_24 {dimension_numbers = #tpu.dot_dimension_numbers<[1], [0], [0], [1], [0, 0, 1, 1], [], []>} : vector<32x32xf32>, vector<32x256xf32>, vector<32x256xf32> -> vector<32x256xf32>
    %c0_25 = arith.constant 0 : index
    %c0_26 = arith.constant 0 : index
    %34 = vector.load %arg9[%c0_25, %c0_26] : memref<32x1xf32, #tpu.memory_space<vmem>>, vector<32x1xf32>
    %35 = vector.broadcast %34 : vector<32x1xf32> to vector<32x256xf32>
    %36 = arith.addf %33, %35 : vector<32x256xf32>
    %cst_27 = arith.constant 0.000000e+00 : f32
    %37 = vector.broadcast %cst_27 : f32 to vector<32x256xf32>
    %38 = arith.maximumf %36, %37 : vector<32x256xf32>
    %c0_28 = arith.constant 0 : index
    %c0_29 = arith.constant 0 : index
    %39 = vector.load %arg10[%c0_28, %c0_29] : memref<1x32xf32, #tpu.memory_space<vmem>>, vector<1x32xf32>
    %cst_30 = arith.constant dense<0.000000e+00> : vector<1x256xf32>
    %40 = tpu.matmul %39, %38, %cst_30 {dimension_numbers = #tpu.dot_dimension_numbers<[1], [0], [0], [1], [0, 0, 1, 1], [], []>} : vector<1x32xf32>, vector<32x256xf32>, vector<1x256xf32> -> vector<1x256xf32>
    %c0_31 = arith.constant 0 : index
    %c0_32 = arith.constant 0 : index
    %41 = vector.load %arg11[%c0_31, %c0_32] : memref<1x1xf32, #tpu.memory_space<vmem>>, vector<1x1xf32>
    %42 = vector.broadcast %41 : vector<1x1xf32> to vector<1x256xf32>
    %43 = arith.addf %40, %42 : vector<1x256xf32>
    %c0_33 = arith.constant 0 : index
    %c0_34 = arith.constant 0 : index
    %c0_35 = arith.constant 0 : index
    %44 = vector.load %arg12[%c0_33, %c0_34, %c0_35] : memref<1x1x256xf32, #tpu.memory_space<vmem>>, vector<1x1x256xf32>
    %45 = vector.shape_cast %44 : vector<1x1x256xf32> to vector<1x256xf32>
    %46 = vector.shape_cast %43 : vector<1x256xf32> to vector<1x1x256xf32>
    tpu.vector_store %arg12[%c0_33, %c0_34, %c0_35], %46 {strides = array<i32>} : memref<1x1x256xf32, #tpu.memory_space<vmem>>, vector<1x1x256xf32>,
    return
  }
  func.func @transform_0(%arg0: i32, %arg1: i32) -> (i32, i32, i32) {
    %c0_i32 = arith.constant 0 : i32
    %c0_i32_0 = arith.constant 0 : i32
    return %arg0, %c0_i32, %arg1 : i32, i32, i32
  }
  func.func @transform_1(%arg0: i32, %arg1: i32) -> (i32, i32, i32) {
    %c0_i32 = arith.constant 0 : i32
    %c0_i32_0 = arith.constant 0 : i32
    return %arg0, %c0_i32, %arg1 : i32, i32, i32
  }
  func.func @transform_2(%arg0: i32, %arg1: i32) -> (i32, i32) {
    %c0_i32 = arith.constant 0 : i32
    %c0_i32_0 = arith.constant 0 : i32
    %c0_i32_1 = arith.constant 0 : i32
    return %c0_i32, %c0_i32_0 : i32, i32
  }
  func.func @transform_3(%arg0: i32, %arg1: i32) -> (i32, i32) {
    %c0_i32 = arith.constant 0 : i32
    %c0_i32_0 = arith.constant 0 : i32
    %c0_i32_1 = arith.constant 0 : i32
    return %c0_i32, %c0_i32_0 : i32, i32
  }
  func.func @transform_4(%arg0: i32, %arg1: i32) -> (i32, i32) {
    %c0_i32 = arith.constant 0 : i32
    %c0_i32_0 = arith.constant 0 : i32
    %c0_i32_1 = arith.constant 0 : i32
    return %c0_i32, %c0_i32_0 : i32, i32
  }
  func.func @transform_5(%arg0: i32, %arg1: i32) -> (i32, i32) {
    %c0_i32 = arith.constant 0 : i32
    %c0_i32_0 = arith.constant 0 : i32
    %c0_i32_1 = arith.constant 0 : i32
    return %c0_i32, %c0_i32_0 : i32, i32
  }
  func.func @transform_6(%arg0: i32, %arg1: i32) -> (i32, i32) {
    %c0_i32 = arith.constant 0 : i32
    %c0_i32_0 = arith.constant 0 : i32
    %c0_i32_1 = arith.constant 0 : i32
    return %c0_i32, %c0_i32_0 : i32, i32
  }
  func.func @transform_7(%arg0: i32, %arg1: i32) -> (i32, i32) {
    %c0_i32 = arith.constant 0 : i32
    %c0_i32_0 = arith.constant 0 : i32
    %c0_i32_1 = arith.constant 0 : i32
    return %c0_i32, %c0_i32_0 : i32, i32
  }
  func.func @transform_8(%arg0: i32, %arg1: i32) -> (i32, i32) {
    %c0_i32 = arith.constant 0 : i32
    %c0_i32_0 = arith.constant 0 : i32
    %c0_i32_1 = arith.constant 0 : i32
    return %c0_i32, %c0_i32_0 : i32, i32
  }
  func.func @transform_9(%arg0: i32, %arg1: i32) -> (i32, i32) {
    %c0_i32 = arith.constant 0 : i32
    %c0_i32_0 = arith.constant 0 : i32
    %c0_i32_1 = arith.constant 0 : i32
    return %c0_i32, %c0_i32_0 : i32, i32
  }
  func.func @transform_10(%arg0: i32, %arg1: i32) -> (i32, i32, i32) {
    %c0_i32 = arith.constant 0 : i32
    %c0_i32_0 = arith.constant 0 : i32
    return %arg0, %c0_i32, %arg1 : i32, i32, i32
  }
}

</mosaic_0001>

<bundles_post_ra>
// kernel: tpu_custom_call.1
= control target key start
LH: loop header
LB: loop body
LE: loop exit
PB: predicated region body
PF: predicated region fallthrough
CT: control target
= control target key end

     0   :  { %s2758_s0 = inlined_call_operand.vmem [shape: f32[2,2,256], index: 0, kind: input, shape index: {}]   ;;  %s2759_s1 = inlined_call_operand.vmem [shape: f32[2,4,256], index: 1, kind: input, shape index: {}]   ;;  %s2760_s2 = inlined_call_operand.vmem [shape: f32[16,1], index: 2, kind: input, shape index: {}]   ;;  %s2761_s3 = inlined_call_operand.vmem [shape: f32[16,1], index: 3, kind: input, shape index: {}]   ;;  %s2762_s4 = inlined_call_operand.vmem [shape: f32[32,36], index: 4, kind: input, shape index: {}]   ;;  %s2763_s5 = inlined_call_operand.vmem [shape: f32[32,1], index: 5, kind: input, shape index: {}]   ;;  %s2764_s6 = inlined_call_operand.vmem [shape: f32[32,32], index: 6, kind: input, shape index: {}]   ;;  %s2765_s7 = inlined_call_operand.vmem [shape: f32[32,1], index: 7, kind: input, shape index: {}]   ;;  %s2766_s8 = inlined_call_operand.vmem [shape: f32[1,32], index: 8, kind: input, shape index: {}]   ;;  %s2767_s9 = inlined_call_operand.<no memory space> [shape: f32[1,1], index: 9, kind: input, shape index: {}]   ;;  %s2768_s10 = inlined_call_operand.hbm [shape: f32[2,1,256], index: 10, kind: output, shape index: {}]  }
   0x1   :  { %v15_v0 = vstv %s2767_s9 }
   0x2   :  { %16 = vst [vmem:[#allocation3] sm:$0x1] %v15_v0 }
   0x3   :  { %17 = vsyncpa [#allocation5], 0 }
   0x4   :  { %19 = vsyncpa [#allocation5 + $0x1], 0  ;;  %s2190_s15 = smov 0   ;;  %s2192_s16 = smov 0  }
   0x5   :  { %s2194_s17 = smov 0   ;;  %s2196_s18 = smov 0  }
   0x6   :  { %s2198_s19 = smov 0   ;;  %s2200_s20 = smov 0  }
   0x7 LB: > { %s1857_s9 = sadd.s32 4294967295, %s2120_s20   ;;  %s1858_s21 = sadd.s32 4294967294, %s2120_s20   ;;  %s2120_s20 = sphi %s2200_s20, %s25_s20   ;;  %s2116_s19 = sphi %s2198_s19, %s2782_s19   ;;  %s2112_s18 = sphi %s2196_s18, %s2781_s18   ;;  %s2108_s17 = sphi %s2194_s17, %s2780_s17   ;;  %s2104_s16 = sphi %s2192_s16, %s2779_s16   ;;  %s2100_s15 = sphi %s2190_s15, %s2778_s15  }
   0x8   : > { %s37_s22 = sadd.s32 1, %s2116_s19  ;;  %s270_s23 = sadd.s32 1, %s2108_s17 }
   0x9   : > { %p39_p0 = scmp.ge.s32.totalorder %s37_s22, 2  ;;  %p280_p1 = scmp.ne.s32.totalorder %s2108_s17, %s2104_s16 }
   0xa   : > { %p281_p2 = scmp.eq.s32.totalorder %s1857_s9, 1  ;;  %p286_p3 = scmp.ne.s32.totalorder %s2104_s16, %s2100_s15 }
   0xb   : > { %s2784_s22 = smov (%p39_p0, %s37_s22), 0  ;;  %p287_p5 = scmp.eq.s32.totalorder %s1858_s21, 1 }
   0xc   : > { %2770 = sst [smem:[#allocation7_spill]] %s2784_s22  ;;  %p2230_p4 = por %p281_p2, %p280_p1 }
   0xd   : > { %s265_s25 = ssub.s32 %s2116_s19, %s2784_s22  ;;  %p1861_p6 = scmp.ge.s32.totalorder %s2120_s20, 1 }
   0xe   : > { %p268_p7 = scmp.eq.s32.totalorder %s265_s25, 0  ;;  %p2237_p8 = por %p287_p5, %p286_p3 }
   0xf   : > { %p355_p9 = scmp.lt.s32.totalorder %s2120_s20, 3 }
  0x10   : > { %s2243_s27 = scalar_select %p268_p7, %s2108_s17, %s270_s23  }
  0x11   : > { %p356_p10 = pnand %p1861_p6, %p355_p9 }
  0x12   : > { %v465_v1 = vld [vmem:[%s2761_s3] sm:$0xff] (!%p356_p10)  ;;  %p407_p11 = scmp.lt.s32.totalorder (!%p356_p10), %s2112_s18, 1  ;;  %v2122_v3 = vmov (!%p356_p10), 0   ;;  %v466_v4 = vld [vmem:[%s2761_s3 + $0x8] sm:$0xff] (!%p356_p10)  ;;  %v1362_v10 = vld [vmem:[%s2763_s5 + $0x18] sm:$0xff] (!%p356_p10)  ;;  %v443_v17 = vlaneseq (!%p356_p10)  ;;  %s403_s13 = sand.u32 (!%p356_p10), 1, %s2104_s16  }
  0x13   : > { %359 = sbr.rel (%p356_p10) target bundleno = 1011 (0x3f3), region = 60  ;;  %v430_v2 = vld [vmem:[%s2760_s2] sm:$0xff] (!%p356_p10)  ;;  %2024 = vset.pattern.permute.xlu1 (!%p356_p10), %v2122_v3  ;;  %2023 = vset.pattern.permute.xlu0 (!%p356_p10), %v2122_v3  ;;  %v431_v5 = vld [vmem:[%s2760_s2 + $0x8] sm:$0xff] (!%p356_p10)  ;;  %v1361_v11 = vld [vmem:[%s2763_s5 + $0x10] sm:$0xff] (!%p356_p10)  ;;  %s1862_s14 = sshll.u32 (!%p356_p10), %s403_s13, 1 }
  0x14   : > { %469 = vperm.xlu1 (!%p356_p10), %2024, %v465_v1   ;;  %434 = vperm.xlu0 (!%p356_p10), %2023, %v430_v2   ;;  %v1360_v7 = vld [vmem:[%s2763_s5 + $0x8] sm:$0xff] (!%p356_p10)  ;;  %v1359_v8 = vld [vmem:[%s2763_s5] sm:$0xff] (!%p356_p10)  ;;  %v1507_v14 = vld [vmem:[%s2765_s7 + $0x18] sm:$0xff] (!%p356_p10)  ;;  %v2294_v19 = vshrl.u32 (!%p356_p10), %v443_v17, 7  ;;  %s405_s21 = scalar_lea.vmem (!%p356_p10), [#allocation4], %s1862_s14  ;;  %s1747_s22 = scalar_lea.sflag (!%p356_p10), [#allocation5], %s403_s13 }
  0x15   : > { %v1505_v12 = vld [vmem:[%s2765_s7 + $0x8] sm:$0xff] (!%p356_p10)  ;;  %v1504_v13 = vld [vmem:[%s2765_s7] sm:$0xff] (!%p356_p10)  ;;  %v1506_v15 = vld [vmem:[%s2765_s7 + $0x10] sm:$0xff] (!%p356_p10) }
  0x16   : > { %v1639_v16 = vld [vmem:[#allocation3] sm:$0x1] (!%p356_p10)  ;;  %v479_v21 = vsub.s32 (!%p356_p10), 1, %v2294_v19  ;;  %v483_v22 = vsub.s32 (!%p356_p10), 3, %v2294_v19  ;;  %v2299_v24 = vsub.s32 (!%p356_p10), 0, %v2294_v19  ;;  %v449_v25 = vsub.s32 (!%p356_p10), 2, %v2294_v19 }
  0x18   : > { %474 = vperm.xlu1 (!%p356_p10), %2024, %v466_v4   ;;  %439 = vperm.xlu0 (!%p356_p10), %2023, %v431_v5  }
  0x1a   : > { %s2253_s12 = scalar_select %p407_p11, %s2112_s18, 1 }
  0x1c   : > { %s1917_s23 = sshll.u32 %s2253_s12, 3  ;;  %1370 = vperm.xlu1 %2024, %v1360_v7   ;;  %1365 = vperm.xlu0 %2023, %v1359_v8   ;;  %s1916_s9 = sshll.u32 %s2253_s12, 2 }
  0x1d   : > { %s424_s29 = scalar_lea.vmem %s2759_s1, %s1917_s23  ;;  %s414_s25 = scalar_lea.vmem %s2758_s0, %s1916_s9 }
  0x1e   : > { %v1339_v6 = vld [vmem:[%s424_s29] sm:$0xff]  ;;  %s1918_s9 = sshll.u32 %s2112_s18, 5  ;;  %s1763_s23 = sshll.u32 %s405_s21, 4  ;;  %s2713_s23 = int_to_ptr.vmem [resolvable:$true] %s1763_s23 }
  0x1f   : > { %v1341_v9 = vcombine.high %v1339_v6, %v1339_v6  ;;  %1343 = vst [vmem:[#allocation2 + $0x40] sm:$0xf] %v1339_v6  ;;  %v427_v18 = vld [vmem:[%s414_s25] sm:$0xf]  ;;  %s2711_s28 = scalar_lea.hbm %s2768_s10, %s1918_s9  ;;  %s2042_s29 = scalar_lea.vmem %s2713_s23, 32 }
  0x20   : > { %1380 = vperm.xlu1 %2024, %v1362_v10   ;;  %1375 = vperm.xlu0 %2023, %v1361_v11   ;;  %v428_v20 = vmul.f32 2.0, %v427_v18  ;;  %v2126_v18 = vmov 2102212464   ;;  %p2043_p12 = scmp.ne.s32.totalorder %s2713_s23, %s2042_s29  ;;  %s2131_s18 = smov [#allocation4]  }
  0x21   : > { %1344 = vst [vmem:[#allocation2 + $0x48] sm:$0xf] %v1341_v9  ;;  %v2123_v9 = vmov 683565275   ;;  %s2046_s30 = sshll.u32 %s2131_s18, 4  ;;  %s2047_s30 = int_to_ptr.vmem [resolvable:$false] %s2046_s30 }
  0x22   : > { %v1867_v23 = vadd.f32 -1.0, %v428_v20  ;;  %p2044_p13 = pnand %p2043_p12, %p2230_p4  ;;  %s2048_s11 = scalar_lea.vmem %s2047_s30, 64 }
  0x23   : > { %p2049_p1 = scmp.lt.s32.totalorder %s2713_s23, %s2047_s30  ;;  %p2050_p2 = scmp.lt.s32.totalorder %s2048_s11, %s2042_s29 }
  0x24   : > { %1515 = vperm.xlu1 %2024, %v1505_v12   ;;  %1510 = vperm.xlu0 %2023, %v1504_v13   ;;  %v480_v26 = vrot.slane %v1867_v23, %v479_v21  ;;  %v484_v27 = vrot.slane %v1867_v23, %v483_v22  ;;  %v446_v28 = vrot.slane %v1867_v23, %v2299_v24  ;;  %v2124_v13 = vmov 2475754826   ;;  %p2045_p0 = pneg %p2044_p13 }
  0x25   : > { %v450_v29 = vrot.slane %v1867_v23, %v449_v25  ;;  %p2051_p3 = por %p2050_p2, %p2049_p1 }
  0x26   : > { %v490_v30 = vrot.slane %v480_v26, %v479_v21  ;;  %v494_v31 = vrot.slane %v484_v27, %v479_v21  ;;  %v456_v32 = vrot.slane %v446_v28, %v2299_v24  ;;  %v2127_v21 = vmov 920167782  }
  0x27   : > { %v460_v33 = vrot.slane %v450_v29, %v2299_v24  ;;  %v2128_v29 = vmov 1326507024   ;;  %p2052_p5 = pnand %p2051_p3, %p2045_p0 }
  0x28   : > { %1525 = vperm.xlu1 %2024, %v1507_v14   ;;  %1520 = vperm.xlu0 %2023, %v1506_v15   ;;  %v2125_v15 = vmov 2131351028  }
  0x2c   : > { %1642 = vperm.xlu0 %2023, %v1639_v16  }
  0x93   : > { %v470_v34 = vpop.permute.xlu1 %469  ;;  %v435_v35 = vpop.permute.xlu0 %434 }
  0x94   : > { %v495_v36 = vmul.f32 %v490_v30, %v470_v34  ;;  %v496_v37 = vmul.f32 %v494_v31, %v470_v34  ;;  %v461_v38 = vmul.f32 %v456_v32, %v435_v35  ;;  %v462_v39 = vmul.f32 %v460_v33, %v435_v35 }
  0x96   : > { %v2305_v40 = vadd.f32 %v495_v36, %v461_v38  ;;  %v2307_v41 = vadd.f32 %v496_v37, %v462_v39 }
  0x97   : > { %v475_v42 = vpop.permute.xlu1 %474  ;;  %v440_v47 = vpop.permute.xlu0 %439 }
  0x98   : > { %v503_v43 = vand.u32 2147483647, %v2305_v40  ;;  %v506_v44 = vand.u32 2139095040, %v2305_v40  ;;  %v607_v45 = vand.u32 2147483647, %v2307_v41  ;;  %v610_v46 = vand.u32 2139095040, %v2307_v41 }
  0x99   : > { %v497_v49 = vmul.f32 %v490_v30, %v475_v42  ;;  %v463_v54 = vmul.f32 %v456_v32, %v440_v47  ;;  %v2320_v63 = vmul.f32 %v494_v31, %v475_v42  ;;  %v2322_v3 = vmul.f32 %v460_v33, %v440_v47 }
  0x9a   : > { %v507_v48 = vshrl.u32 %v506_v44, 23  ;;  %v510_v50 = vand.u32 8388607, %v503_v43  ;;  %v611_v51 = vshrl.u32 %v610_v46, 23  ;;  %v614_v52 = vand.u32 8388607, %v607_v45 }
  0x9b   : > { %v2317_v57 = vadd.f32 %v497_v49, %v463_v54  ;;  %vm505_vm13 = vcmp.lt.s32.totalorder %v2305_v40, 0  ;;  %vm609_vm14 = vcmp.lt.s32.totalorder %v2307_v41, 0  ;;  %vm2412_vm15 = vcmp.le.f32.partialorder %v503_v43, 0.7853982 }
  0x9c   : > { %v1868_v53 = vadd.s32 4294967169, %v507_v48  ;;  %v1872_v55 = vadd.s32 4294967169, %v611_v51  ;;  %v511_v58 = vor.u32 8388608, %v510_v50  ;;  %v615_v59 = vor.u32 8388608, %v614_v52 }
  0x9d   : > { %v714_v61 = vand.u32 2139095040, %v2317_v57  ;;  %v711_v7 = vand.u32 2147483647, %v2317_v57 }
  0x9e   : > { %v513_v56 = vadd.s32 1, %v1868_v53  ;;  %v617_v60 = vadd.s32 1, %v1872_v55  ;;  %v2324_v4 = vshll.u32 %v511_v58, 8  ;;  %v2328_v6 = vshll.u32 %v615_v59, 8 }
  0x9f   : > { %v2332_v12 = vshrl.u32 %v714_v61, 23 }
  0xa0   : > { %vm514_vm0 = vcmp.gt.s32.totalorder %v513_v56, 0  ;;  %vm618_vm1 = vcmp.gt.s32.totalorder %v617_v60, 0 }
  0xa1   : > { %v515_v62 = vsel %vm514_vm0, %v513_v56, 0  ;;  %v619_v2 = vsel %vm618_vm1, %v617_v60, 0  ;;  %vm2426_vm0 = vcmp.le.f32.partialorder %v607_v45, 0.7853982 }
  0xa2   : > { %v516_v0 = vshrl.u32 %v515_v62, 5  ;;  %v517_v1 = vand.u32 31, %v515_v62  ;;  %v2326_v5 = vshrl.u32 %v619_v2, 5  ;;  %v621_v11 = vand.u32 31, %v619_v2 }
  0xa4   : > { %v518_v8 = vsub.s32 32, %v517_v1  ;;  %v520_v10 = vshll.u32 %v2123_v9, %v517_v1  ;;  %v523_v14 = vshll.u32 %v2124_v13, %v517_v1  ;;  %v526_v16 = vshll.u32 %v2125_v15, %v517_v1 }
  0xa5   : > { %v529_v20 = vshll.u32 %v2126_v18, %v517_v1  ;;  %v532_v22 = vshll.u32 %v2127_v21, %v517_v1  ;;  %vm535_vm2 = vcmp.lt.s32.totalorder %v516_v0, 1  ;;  %vm536_vm3 = vcmp.lt.s32.totalorder %v516_v0, 2 }
  0xa6   : > { %v521_v23 = vshrl.u32 %v2124_v13, %v518_v8  ;;  %v524_v25 = vshrl.u32 %v2125_v15, %v518_v8  ;;  %v527_v26 = vshrl.u32 %v2126_v18, %v518_v8  ;;  %v519_v27 = vshrl.u32 %v2123_v9, %v518_v8 }
  0xa7   : > { %v530_v28 = vshrl.u32 %v2127_v21, %v518_v8  ;;  %v533_v30 = vshrl.u32 %v2128_v29, %v518_v8  ;;  %v622_v34 = vsub.s32 32, %v621_v11  ;;  %vm537_vm4 = vcmp.lt.s32.totalorder %v516_v0, 3 }
  0xa8   : > { %v522_v31 = vor.u32 %v521_v23, %v520_v10  ;;  %v525_v32 = vor.u32 %v524_v25, %v523_v14  ;;  %v528_v33 = vor.u32 %v527_v26, %v526_v16  ;;  %vm538_vm5 = vcmp.lt.s32.totalorder %v516_v0, 4 }
  0xa9   : > { %v531_v35 = vor.u32 %v530_v28, %v529_v20  ;;  %v534_v36 = vor.u32 %v533_v30, %v532_v22  ;;  %v624_v48 = vshll.u32 %v2123_v9, %v621_v11  ;;  %v625_v51 = vshrl.u32 %v2124_v13, %v622_v34 }
  0xaa   : > { %v539_v37 = vsel %vm535_vm2, %v519_v27, %v522_v31  ;;  %v540_v38 = vsel %vm538_vm5, %v528_v33, 2102212464  ;;  %v543_v39 = vsel %vm535_vm2, %v522_v31, %v525_v32  ;;  %v547_v42 = vsel %vm535_vm2, %v525_v32, %v528_v33 }
  0xab   : > { %v541_v44 = vsel %vm537_vm4, %v525_v32, %v540_v38  ;;  %v544_v46 = vsel %vm538_vm5, %v531_v35, 920167782  ;;  %v548_v47 = vsel %vm538_vm5, %v534_v36, 1326507024  ;;  %v627_v52 = vshll.u32 %v2124_v13, %v621_v11 }
  0xac   : > { %v545_v49 = vsel %vm537_vm4, %v528_v33, %v544_v46  ;;  %v549_v50 = vsel %vm537_vm4, %v531_v35, %v548_v47  ;;  %v542_v53 = vsel %vm536_vm3, %v539_v37, %v541_v44  ;;  %v628_v56 = vshrl.u32 %v2125_v15, %v622_v34 }
  0xad   : > { %v546_v54 = vsel %vm536_vm3, %v543_v39, %v545_v49  ;;  %v550_v55 = vsel %vm536_vm3, %v547_v42, %v549_v50  ;;  %v626_v62 = vor.u32 %v625_v51, %v624_v48  ;;  %v630_v2 = vshll.u32 %v2125_v15, %v621_v11 }
  0xae   : > { %v2355_v58 = vmul.u32.u64.low %v2324_v4, %v550_v55  ;;  %v2356_v59 = vmul.u32.u64.high %v2324_v4, %v550_v55, %v2355_v58  ;;  %v2359_v60 = vmul.u32.u64.low %v2324_v4, %v546_v54  ;;  %v2360_v61 = vmul.u32.u64.high %v2324_v4, %v546_v54, %v2359_v60 }
  0xaf   : > { %v629_v1 = vor.u32 %v628_v56, %v627_v52  ;;  %v631_v8 = vshrl.u32 %v2126_v18, %v622_v34  ;;  %v623_v0 = vshrl.u32 %v2123_v9, %v622_v34  ;;  %v633_v10 = vshll.u32 %v2126_v18, %v621_v11 }
  0xb0   : > { %v634_v14 = vshrl.u32 %v2127_v21, %v622_v34  ;;  %v637_v16 = vshrl.u32 %v2128_v29, %v622_v34  ;;  %v558_v20 = vmul.u32 %v2324_v4, %v542_v53  ;;  %v636_v23 = vshll.u32 %v2127_v21, %v621_v11 }
  0xb1   : > { %v632_v22 = vor.u32 %v631_v8, %v630_v2  ;;  %vm639_vm6 = vcmp.lt.s32.totalorder %v2326_v5, 1  ;;  %vm560_vm7 = vc.u32 %v2356_v59, %v2359_v60  ;;  %v561_v25 = vadd.s32 1, %v2360_v61 }
  0xb2   : > { %v635_v26 = vor.u32 %v634_v14, %v633_v10  ;;  %vm640_vm8 = vcmp.lt.s32.totalorder %v2326_v5, 2  ;;  %v638_v27 = vor.u32 %v637_v16, %v636_v23  ;;  %vm641_vm9 = vcmp.lt.s32.totalorder %v2326_v5, 3 }
  0xb3   : > { %vm642_vm10 = vcmp.lt.s32.totalorder %v2326_v5, 4  ;;  %v647_v28 = vsel %vm639_vm6, %v626_v62, %v629_v1  ;;  %v562_v4 = vsel %vm560_vm7, %v561_v25, %v2360_v61  ;;  %v651_v31 = vsel %vm639_vm6, %v629_v1, %v632_v22 }
  0xb4   : > { %v644_v30 = vsel %vm642_vm10, %v632_v22, 2102212464  ;;  %v648_v11 = vsel %vm642_vm10, %v635_v26, 920167782  ;;  %v563_v32 = vadd.s32 %v562_v4, %v558_v20  ;;  %v643_v33 = vsel %vm639_vm6, %v623_v0, %v626_v62 }
  0xb5   : > { %v649_v34 = vsel %vm641_vm9, %v632_v22, %v648_v11  ;;  %v652_v35 = vsel %vm642_vm10, %v638_v27, 1326507024  ;;  %v645_v36 = vsel %vm641_vm9, %v629_v1, %v644_v30  ;;  %v1876_v39 = vadd.s32 4294967169, %v2332_v12 }
  0xb6   : > { %v650_v37 = vsel %vm640_vm8, %v647_v28, %v649_v34  ;;  %v653_v38 = vsel %vm641_vm9, %v635_v26, %v652_v35  ;;  %v564_v42 = vadd.s32 536870912, %v563_v32  ;;  %v646_v51 = vsel %vm640_vm8, %v643_v33, %v645_v36 }
  0xb7   : > { %v654_v44 = vsel %vm640_vm8, %v651_v31, %v653_v38  ;;  %v2385_v46 = vmul.u32.u64.low %v2328_v6, %v650_v37  ;;  %v2386_v47 = vmul.u32.u64.high %v2328_v6, %v650_v37, %v2385_v46  ;;  %v2396_v52 = vadd.f32 %v2320_v63, %v2322_v3 }
  0xb8   : > { %v2389_v48 = vmul.u32.u64.low %v2328_v6, %v654_v44  ;;  %v2390_v49 = vmul.u32.u64.high %v2328_v6, %v654_v44, %v2389_v48  ;;  %v565_v50 = vshrl.u32 %v564_v42, 30  ;;  %v721_v12 = vadd.s32 1, %v1876_v39 }
  0xb9   : > { %v665_v54 = vadd.s32 1, %v2386_v47  ;;  %v718_v55 = vand.u32 8388607, %v711_v7  ;;  %v662_v56 = vmul.u32 %v2328_v6, %v646_v51  ;;  %v818_v63 = vand.u32 2139095040, %v2396_v52 }
  0xba   : > { %v566_v53 = vshll.u32 %v565_v50, 30  ;;  %vm722_vm11 = vcmp.gt.s32.totalorder %v721_v12, 0  ;;  %vm664_vm12 = vc.u32 %v2390_v49, %v2385_v46  ;;  %v589_v5 = vsub.s32 4, %v565_v50 }
  0xbb   : > { %v723_v58 = vsel %vm722_vm11, %v721_v12, 0  ;;  %v666_v62 = vsel %vm664_vm12, %v665_v54, %v2386_v47  ;;  %v719_v8 = vor.u32 8388608, %v718_v55  ;;  %v815_v10 = vand.u32 2147483647, %v2396_v52 }
  0xbc   : > { %v567_v61 = vsub.s32 %v563_v32, %v566_v53  ;;  %v667_v3 = vadd.s32 %v666_v62, %v662_v56  ;;  %v725_v1 = vand.u32 31, %v723_v58  ;;  %v590_v6 = vsel %vm505_vm13, %v589_v5, %v565_v50 }
  0xbd   : > { %v819_v20 = vshrl.u32 %v818_v63, 23  ;;  %v559_v25 = vadd.s32 %v2359_v60, %v2356_v59  ;;  %v2418_v27 = vshll.u32 %v719_v8, 8  ;;  %v2422_v28 = vsel %vm2412_vm15, 0, %v590_v6 }
  0xbe   : > { %v569_v2 = vsub.s32 0, %v567_v61  ;;  %v668_v0 = vadd.s32 536870912, %v667_v3  ;;  %v726_v16 = vsub.s32 32, %v725_v1  ;;  %v2431_v43 = vadd.s32 %v2385_v46, %v2390_v49 }
  0xbf   : > { %v2435_v59 = vand.u32 8388607, %v815_v10  ;;  %v2437_v11 = vshrl.u32 %v723_v58, 5  ;;  %v2440_v32 = vadd.s32 4294967169, %v819_v20  ;;  %v2447_v36 = vadd.s32 3, %v2422_v28 }
  0xc0   : > { %v1869_v14 = vmin.u32 %v569_v2, %v567_v61  ;;  %v669_v22 = vshrl.u32 %v668_v0, 30  ;;  %v729_v31 = vshrl.u32 %v2124_v13, %v726_v16  ;;  %v732_v34 = vshrl.u32 %v2125_v15, %v726_v16 }
  0xc1   : > { %v735_v35 = vshrl.u32 %v2126_v18, %v726_v16  ;;  %v728_v37 = vshll.u32 %v2123_v9, %v725_v1  ;;  %v731_v38 = vshll.u32 %v2124_v13, %v725_v1  ;;  %v734_v44 = vshll.u32 %v2125_v15, %v725_v1 }
  0xc2   : > { %v571_v26 = vclz %v1869_v14  ;;  %v670_v30 = vshll.u32 %v669_v22, 30  ;;  %v693_v45 = vsub.s32 4, %v669_v22  ;;  %v738_v46 = vshrl.u32 %v2127_v21, %v726_v16 }
  0xc3   : > { %v730_v49 = vor.u32 %v729_v31, %v728_v37  ;;  %v737_v50 = vshll.u32 %v2126_v18, %v725_v1  ;;  %v733_v53 = vor.u32 %v732_v34, %v731_v38  ;;  %v736_v54 = vor.u32 %v735_v35, %v734_v44 }
  0xc4   : > { %v1870_v60 = vadd.s32 4294967294, %v571_v26  ;;  %v2442_v33 = vsub.s32 %v667_v3, %v670_v30  ;;  %v694_v12 = vsel %vm609_vm14, %v693_v45, %v669_v22  ;;  %v741_v5 = vshrl.u32 %v2128_v29, %v726_v16 }
  0xc5   : > { %v739_v63 = vor.u32 %v738_v46, %v737_v50  ;;  %v740_v3 = vshll.u32 %v2127_v21, %v725_v1  ;;  %vm743_vm2 = vcmp.lt.s32.totalorder %v2437_v11, 1  ;;  %v696_v0 = vsel %vm2426_vm0, 0, %v694_v12 }
  0xc6   : > { %vm1871_vm1 = vcmp.lt.s32.totalorder %v1870_v60, 0  ;;  %v673_v42 = vsub.s32 0, %v2442_v33  ;;  %v727_v14 = vshrl.u32 %v2123_v9, %v726_v16  ;;  %vm744_vm3 = vcmp.lt.s32.totalorder %v2437_v11, 2 }
  0xc7   : > { %v574_v39 = vsel %vm1871_vm1, 0, %v1870_v60  ;;  %v742_v20 = vor.u32 %v741_v5, %v740_v3  ;;  %vm746_vm4 = vcmp.lt.s32.totalorder %v2437_v11, 4  ;;  %vm745_vm5 = vcmp.lt.s32.totalorder %v2437_v11, 3 }
  0xc8   : > { %v575_v47 = vsub.s32 32, %v574_v39  ;;  %v579_v48 = vsub.s32 4294967266, %v574_v39  ;;  %v1873_v51 = vmin.u32 %v673_v42, %v2442_v33  ;;  %v576_v55 = vshll.u32 %v567_v61, %v574_v39 }
  0xc9   : > { %v748_v1 = vsel %vm746_vm4, %v736_v54, 2102212464  ;;  %v751_v22 = vsel %vm743_vm2, %v730_v49, %v733_v53  ;;  %v747_v16 = vsel %vm743_vm2, %v727_v14, %v730_v49  ;;  %v752_v26 = vsel %vm746_vm4, %v739_v63, 920167782 }
  0xca   : > { %v577_v56 = vshrl.u32 %v559_v25, %v575_v47  ;;  %v580_v58 = vadd.s32 127, %v579_v48  ;;  %v675_v62 = vclz %v1873_v51  ;;  %v749_v31 = vsel %vm745_vm5, %v733_v53, %v748_v1 }
  0xcb   : > { %v753_v45 = vsel %vm745_vm5, %v736_v54, %v752_v26  ;;  %v755_v38 = vsel %vm743_vm2, %v733_v53, %v736_v54  ;;  %v756_v42 = vsel %vm746_vm4, %v742_v20, 1326507024  ;;  %v750_v12 = vsel %vm744_vm3, %v747_v16, %v749_v31 }
  0xcc   : > { %v578_v2 = vor.u32 %v577_v56, %v576_v55  ;;  %v581_v8 = vshll.u32 %v580_v58, 23  ;;  %v1874_v6 = vadd.s32 4294967294, %v675_v62  ;;  %v754_v37 = vsel %vm744_vm3, %v751_v22, %v753_v45 }
  0xcd   : > { %v2486_v44 = vmul.u32.u64.low %v2418_v27, %v754_v37  ;;  %v2487_v46 = vmul.u32.u64.high %v2418_v27, %v754_v37, %v2486_v44  ;;  %v757_v50 = vsel %vm745_vm5, %v739_v63, %v756_v42  ;;  %v825_v54 = vadd.s32 1, %v2440_v32 }
  0xce   : > { %v582_v61 = vor.u32 4788187, %v581_v8  ;;  %v585_v25 = vcvt.s32.f32 %v578_v2  ;;  %vm1875_vm6 = vcmp.lt.s32.totalorder %v1874_v6, 0  ;;  %v758_v53 = vsel %vm744_vm3, %v755_v38, %v757_v50 }
  0xcf   : > { %v678_v60 = vsel %vm1875_vm6, 0, %v1874_v6  ;;  %v700_v5 = vadd.s32 3, %v696_v0  ;;  %v769_v62 = vadd.s32 1, %v2487_v46  ;;  %vm826_vm7 = vcmp.gt.s32.totalorder %v825_v54, 0 }
  0xd0   : > { %v583_v30 = vand.u32 2147483647, %v582_v61  ;;  %v679_v34 = vsub.s32 32, %v678_v60  ;;  %v683_v35 = vsub.s32 4294967266, %v678_v60  ;;  %v680_v47 = vshll.u32 %v2442_v33, %v678_v60 }
  0xd1   : > { %v2500_v58 = vmul.u32.u64.low %v2418_v27, %v758_v53  ;;  %v2501_v33 = vmul.u32.u64.high %v2418_v27, %v758_v53, %v2500_v58  ;;  %v2510_v32 = vand.u32 3, %v2422_v28  ;;  %v827_v3 = vsel %vm826_vm7, %v825_v54, 0 }
  0xd2   : > { %v586_v39 = vmul.f32 %v585_v25, %v583_v30  ;;  %v681_v48 = vshrl.u32 %v2431_v43, %v679_v34  ;;  %v684_v49 = vadd.s32 127, %v683_v35  ;;  %v2513_v2 = vand.u32 3, %v2447_v36 }
  0xd3   : > { %v766_v8 = vmul.u32 %v2418_v27, %v750_v12  ;;  %v829_v14 = vand.u32 31, %v827_v3  ;;  %vm768_vm8 = vc.u32 %v2501_v33, %v2486_v44  ;;  %v2518_v23 = vand.u32 3, %v700_v5 }
  0xd4   : > { %v587_v51 = vxor.u32 2147483648, %v586_v39  ;;  %v682_v55 = vor.u32 %v681_v48, %v680_v47  ;;  %v685_v56 = vshll.u32 %v684_v49, 23  ;;  %v2520_v61 = vand.u32 3, %v696_v0 }
  0xd5   : > { %v770_v28 = vsel %vm768_vm8, %v769_v62, %v2487_v46  ;;  %v830_v1 = vsub.s32 32, %v829_v14  ;;  %v2523_v36 = vshrl.u32 %v827_v3, 5  ;;  %v832_v27 = vshll.u32 %v2123_v9, %v829_v14 }
  0xd6   : > { %v588_v43 = vsel %vm505_vm13, %v587_v51, %v586_v39  ;;  %v686_v63 = vor.u32 4788187, %v685_v56  ;;  %v689_v20 = vcvt.s32.f32 %v682_v55  ;;  %v771_v25 = vadd.s32 %v770_v28, %v766_v8 }
  0xd7   : > { %v591_v11 = vsel %vm2412_vm15, %v2305_v40, %v588_v43  ;;  %vm602_vm9 = vcmp.eq.s32.totalorder %v2513_v2, 2  ;;  %vm1021_vm10 = vcmp.eq.s32.totalorder %v2510_v32, 2  ;;  %v833_v16 = vshrl.u32 %v2124_v13, %v830_v1 }
  0xd8   : > { %2026 = vcosq.f32 %v591_v11  ;;  %v687_v6 = vand.u32 2147483647, %v686_v63  ;;  %v836_v26 = vshrl.u32 %v2125_v15, %v830_v1  ;;  %v838_v0 = vshll.u32 %v2125_v15, %v829_v14 }
  0xd9   : > { %2028 = vsinq.f32 %v591_v11  ;;  %v839_v30 = vshrl.u32 %v2126_v18, %v830_v1  ;;  %vm599_vm11 = vcmp.eq.s32.totalorder %v2513_v2, 0  ;;  %vm1018_vm12 = vcmp.eq.s32.totalorder %v2510_v32, 0 }
  0xda   : > { %v690_v22 = vmul.f32 %v689_v20, %v687_v6  ;;  %v772_v31 = vadd.s32 536870912, %v771_v25  ;;  %v835_v45 = vshll.u32 %v2124_v13, %v829_v14  ;;  %v842_v34 = vshrl.u32 %v2127_v21, %v830_v1 }
  0xdb   : > { %vm598_vm13 = vcmp.lt.s32.totalorder %v2513_v2, 2  ;;  %vm1017_vm15 = vcmp.lt.s32.totalorder %v2510_v32, 2  ;;  %v823_v35 = vor.u32 8388608, %v2435_v59  ;;  %v834_v37 = vor.u32 %v833_v16, %v832_v27 }
  0xdc   : > { %v691_v60 = vxor.u32 2147483648, %v690_v22  ;;  %v840_v15 = vor.u32 %v839_v30, %v838_v0  ;;  %v841_v38 = vshll.u32 %v2126_v18, %v829_v14  ;;  %vm595_vm1 = vweird.f32 %v2305_v40 }
  0xdd   : > { %v2543_v42 = vshrl.u32 %v772_v31, 30  ;;  %v831_v13 = vshrl.u32 %v2123_v9, %v830_v1  ;;  %v837_v46 = vor.u32 %v836_v26, %v835_v45  ;;  %v844_v59 = vshll.u32 %v2127_v21, %v829_v14 }
  0xde   : > { %v692_v39 = vsel %vm609_vm14, %v691_v60, %v690_v22  ;;  %v843_v48 = vor.u32 %v842_v34, %v841_v38  ;;  %v845_v49 = vshrl.u32 %v2128_v29, %v830_v1  ;;  %vm847_vm2 = vcmp.lt.s32.totalorder %v2523_v36, 1 }
  0xdf   : > { %v695_v47 = vsel %vm2426_vm0, %v2307_v41, %v692_v39  ;;  %v774_v18 = vshll.u32 %v2543_v42, 30  ;;  %vm850_vm14 = vcmp.lt.s32.totalorder %v2523_v36, 4  ;;  %vm849_vm3 = vcmp.lt.s32.totalorder %v2523_v36, 3 }
  0xe0   : > { %2030 = vcosq.f32 %v695_v47  ;;  %v851_v9 = vsel %vm847_vm2, %v831_v13, %v834_v37  ;;  %v852_v4 = vsel %vm850_vm14, %v840_v15, 2102212464  ;;  %vm848_vm0 = vcmp.lt.s32.totalorder %v2523_v36, 2 }
  0xe1   : > { %2032 = vsinq.f32 %v695_v47  ;;  %v2559_v29 = vsub.s32 %v771_v25, %v774_v18  ;;  %v853_v12 = vsel %vm849_vm3, %v837_v46, %v852_v4  ;;  %v846_v54 = vor.u32 %v845_v49, %v844_v59 }
  0xe2   : > { %v2027_v50 = vpop.eup %2026  ;;  %v854_v55 = vsel %vm848_vm0, %v851_v9, %v853_v12  ;;  %v856_v56 = vsel %vm850_vm14, %v843_v48, 920167782  ;;  %v855_v62 = vsel %vm847_vm2, %v834_v37, %v837_v46  ;;  %v863_v8 = vshll.u32 %v823_v35, 8 }
  0xe3   : > { %v2029_v21 = vpop.eup %2028  ;;  %v603_v51 = vxor.u32 2147483648, %v2027_v50  ;;  %v777_v5 = vsub.s32 0, %v2559_v29  ;;  %v857_v3 = vsel %vm849_vm3, %v840_v15, %v856_v56  ;;  %v859_v28 = vsel %vm847_vm2, %v837_v46, %v840_v15 }
  0xe4   : > { %v600_v53 = vxor.u32 2147483648, %v2029_v21  ;;  %v858_v2 = vsel %vm848_vm0, %v855_v62, %v857_v3  ;;  %v860_v32 = vsel %vm850_vm14, %v846_v54, 1326507024  ;;  %vm699_vm4 = vweird.f32 %v2307_v41 }
  0xe5   : > { %v604_v58 = vsel %vm602_vm9, %v603_v51, %v2029_v21  ;;  %v1023_v43 = vsel %vm1021_vm10, %v603_v51, %v2029_v21  ;;  %v1877_v20 = vmin.u32 %v777_v5, %v2559_v29  ;;  %vm1120_vm5 = vcmp.lt.s32.totalorder %v2520_v61, 2 }
  0xe6   : > { %v601_v11 = vsel %vm599_vm11, %v2027_v50, %v600_v53  ;;  %v1020_v63 = vsel %vm1018_vm12, %v2027_v50, %v600_v53  ;;  %vm1121_vm6 = vcmp.eq.s32.totalorder %v2520_v61, 0  ;;  %vm1124_vm7 = vcmp.eq.s32.totalorder %v2520_v61, 2 }
  0xe7   : > { %v605_v14 = vsel %vm598_vm13, %v601_v11, %v604_v58  ;;  %v1024_v6 = vsel %vm1017_vm15, %v1020_v63, %v1023_v43  ;;  %v779_v25 = vclz %v1877_v20  ;;  %v861_v40 = vsel %vm849_vm3, %v843_v48, %v860_v32 }
  0xe8   : > { %v2590_v1 = vsel %vm595_vm1, nan, %v605_v14  ;;  %v2594_v22 = vsel %vm595_vm1, nan, %v1024_v6  ;;  %v2606_v27 = vmul.u32.u64.low %v863_v8, %v858_v2  ;;  %v2607_v16 = vmul.u32.u64.high %v863_v8, %v858_v2, %v2606_v27 }
  0xe9   : > { %vm702_vm8 = vcmp.lt.s32.totalorder %v2518_v23, 2  ;;  %vm703_vm9 = vcmp.eq.s32.totalorder %v2518_v23, 0  ;;  %v1878_v0 = vadd.s32 4294967294, %v779_v25  ;;  %v862_v30 = vsel %vm848_vm0, %v859_v28, %v861_v40 }
  0xea   : > { %v2031_v26 = vpop.eup %2030  ;;  %v2613_v45 = vmul.u32.u64.low %v863_v8, %v862_v30  ;;  %v2614_v34 = vmul.u32.u64.high %v863_v8, %v862_v30, %v2613_v45  ;;  %vm706_vm10 = vcmp.eq.s32.totalorder %v2518_v23, 2  ;;  %v767_v37 = vadd.s32 %v2486_v44, %v2501_v33 }
  0xeb   : > { %v2033_v60 = vpop.eup %2032  ;;  %v707_v31 = vxor.u32 2147483648, %v2031_v26  ;;  %vm1879_vm11 = vcmp.lt.s32.totalorder %v1878_v0, 0  ;;  %v2129_v15 = vmov 0.0   ;;  %v873_v13 = vadd.s32 1, %v2607_v16 }
  0xec   : > { %v704_v35 = vxor.u32 2147483648, %v2033_v60  ;;  %1467 = vmatprep.mubr.f32.mxu0 %v2129_v15  ;;  %1605 = vmatprep.mubr.f32.mxu1 %v2129_v15  ;;  %v782_v39 = vsel %vm1879_vm11, 0, %v1878_v0  ;;  %v870_v33 = vmul.u32 %v863_v8, %v854_v55  ;;  %v871_v18 = vadd.s32 %v2606_v27, %v2614_v34 }
  0xed   : > { %v708_v38 = vsel %vm706_vm10, %v707_v31, %v2033_v60  ;;  %v1126_v36 = vsel %vm1124_vm7, %v707_v31, %v2033_v60  ;;  %v783_v44 = vsub.s32 32, %v782_v39  ;;  %v787_v49 = vsub.s32 4294967266, %v782_v39 }
  0xee   : > { %v705_v46 = vsel %vm703_vm9, %v2031_v26, %v704_v35  ;;  %v1123_v47 = vsel %vm1121_vm6, %v2031_v26, %v704_v35  ;;  %vm872_vm12 = vc.u32 %v2614_v34, %v2606_v27  ;;  %v784_v23 = vshll.u32 %v2559_v29, %v782_v39 }
  0xef   : > { %v709_v48 = vsel %vm702_vm8, %v705_v46, %v708_v38  ;;  %v1127_v59 = vsel %vm1120_vm5, %v1123_v47, %v1126_v36  ;;  %v785_v4 = vshrl.u32 %v767_v37, %v783_v44  ;;  %v788_v21 = vadd.s32 127, %v787_v49 }
  0xf0   : > { %v2635_v50 = vsel %vm699_vm4, nan, %v709_v48  ;;  %v2639_v9 = vsel %vm699_vm4, nan, %v1127_v59  ;;  %v874_v61 = vsel %vm872_vm12, %v873_v13, %v2607_v16  ;;  %v797_v62 = vsub.s32 4, %v2543_v42 }
  0xf1   : > { %v875_v51 = vadd.s32 %v874_v61, %v870_v33  ;;  %v786_v12 = vor.u32 %v785_v4, %v784_v23  ;;  %v789_v53 = vshll.u32 %v788_v21, 23  ;;  %vm713_vm13 = vcmp.lt.s32.totalorder %v2317_v57, 0 }
  0xf2   : > { %vm712_vm15 = vcmp.le.f32.partialorder %v711_v7, 0.7853982  ;;  %v798_v8 = vsel %vm713_vm13, %v797_v62, %v2543_v42  ;;  %vm803_vm2 = vweird.f32 %v2317_v57  ;;  %vm817_vm7 = vcmp.lt.s32.totalorder %v2396_v52, 0 }
  0xf3   : > { %v876_v54 = vadd.s32 536870912, %v875_v51  ;;  %v790_v55 = vor.u32 4788187, %v789_v53  ;;  %v793_v43 = vcvt.s32.f32 %v786_v12  ;;  %v800_v20 = vsel %vm712_vm15, 0, %v798_v8 }
  0xf4   : > { %v804_v32 = vadd.s32 3, %v800_v20  ;;  %v1222_v26 = vand.u32 3, %v800_v20  ;;  %vm816_vm8 = vcmp.le.f32.partialorder %v815_v10, 0.7853982  ;;  %v1358_v20 = vld [vmem:[#allocation2 + $0x48] sm:$0xf] }
  0xf5   : > { %v877_v56 = vshrl.u32 %v876_v54, 30  ;;  %v791_v58 = vand.u32 2147483647, %v790_v55 }
  0xf6   : > { %v805_v16 = vand.u32 3, %v804_v32  ;;  %vm1227_vm0 = vcmp.eq.s32.totalorder %v1222_v26, 2  ;;  %vm1224_vm4 = vcmp.eq.s32.totalorder %v1222_v26, 0  ;;  %vm1223_vm6 = vcmp.lt.s32.totalorder %v1222_v26, 2  ;;  %v1366_v32 = vpop.permute.xlu0 %1365 }
  0xf7   : > { %v878_v5 = vshll.u32 %v877_v56, 30  ;;  %v794_v41 = vmul.f32 %v793_v43, %v791_v58 }
  0xf8   : > { %vm807_vm14 = vcmp.eq.s32.totalorder %v805_v16, 0  ;;  %vm810_vm3 = vcmp.eq.s32.totalorder %v805_v16, 2  ;;  %vm806_vm5 = vcmp.lt.s32.totalorder %v805_v16, 2 }
  0xf9   : > { %v879_v11 = vsub.s32 %v875_v51, %v878_v5  ;;  %v795_v63 = vxor.u32 2147483648, %v794_v41 }
  0xfb   : > { %v881_v29 = vsub.s32 0, %v879_v11  ;;  %v796_v3 = vsel %vm713_vm13, %v795_v63, %v794_v41 }
  0xfc   : > { %v799_v14 = vsel %vm712_vm15, %v2317_v57, %v796_v3 }
  0xfd   : > { %v1881_v6 = vmin.u32 %v881_v29, %v879_v11  ;;  %2034 = vcosq.f32 %v799_v14 }
  0xfe   : > { %2036 = vsinq.f32 %v799_v14 }
  0xff   : > { %v883_v28 = vclz %v1881_v6 }
 0x101   : > { %v1882_v2 = vadd.s32 4294967294, %v883_v28  ;;  %v1345_v28 = vld [vmem:[%s2762_s4] sm:$0xff] }
 0x103   : > { %vm1883_vm1 = vcmp.lt.s32.totalorder %v1882_v2, 0 }
 0x104   : > { %v886_v25 = vsel %vm1883_vm1, 0, %v1882_v2  ;;  %vm907_vm1 = vweird.f32 %v2396_v52 }
 0x105   : > { %v887_v40 = vsub.s32 32, %v886_v25  ;;  %v891_v27 = vsub.s32 4294967266, %v886_v25  ;;  %v888_v0 = vshll.u32 %v879_v11, %v886_v25 }
 0x107   : > { %v889_v7 = vshrl.u32 %v871_v18, %v887_v40  ;;  %v892_v30 = vadd.s32 127, %v891_v27  ;;  %v2035_v60 = vpop.eup %2034  ;;  %v901_v18 = vsub.s32 4, %v877_v56  ;;  %v1371_v40 = vpop.permute.xlu1 %1370 }
 0x108   : > { %v2037_v42 = vpop.eup %2036  ;;  %v811_v31 = vxor.u32 2147483648, %v2035_v60 }
 0x109   : > { %v890_v45 = vor.u32 %v889_v7, %v888_v0  ;;  %v893_v34 = vshll.u32 %v892_v30, 23  ;;  %v808_v35 = vxor.u32 2147483648, %v2037_v42  ;;  %v902_v21 = vsel %vm817_vm7, %v901_v18, %v877_v56 }
 0x10a   : > { %v812_v37 = vsel %vm810_vm3, %v811_v31, %v2037_v42  ;;  %v1229_v36 = vsel %vm1227_vm0, %v811_v31, %v2037_v42  ;;  %v904_v51 = vsel %vm816_vm8, 0, %v902_v21  ;;  %v1500_v21 = vld [vmem:[%s2764_s6] sm:$0xff]  ;;  %vm1528_vm3 = vcmask 261120  }
 0x10b   : > { %v894_v38 = vor.u32 4788187, %v893_v34  ;;  %v809_v39 = vsel %vm807_vm14, %v2035_v60, %v808_v35  ;;  %v1226_v13 = vsel %vm1224_vm4, %v2035_v60, %v808_v35  ;;  %v897_v44 = vcvt.s32.f32 %v890_v45 }
 0x10c   : > { %v813_v46 = vsel %vm806_vm5, %v809_v39, %v812_v37  ;;  %v1230_v33 = vsel %vm1223_vm6, %v1226_v13, %v1229_v36  ;;  %v908_v12 = vadd.s32 3, %v904_v51  ;;  %v1325_v54 = vand.u32 3, %v904_v51  ;;  %v1376_v37 = vpop.permute.xlu0 %1375  ;;  %v1381_v39 = vpop.permute.xlu1 %1380  ;;  %v1502_v51 = vld [vmem:[%s2764_s6 + $0x10] sm:$0xff] }
 0x10d   : > { %v895_v47 = vand.u32 2147483647, %v894_v38  ;;  %v814_v48 = vsel %vm803_vm2, nan, %v813_v46  ;;  %v1231_v59 = vsel %vm803_vm2, nan, %v1230_v33  ;;  %vm1396_vm2 = vcmask 1043456  }
 0x10e   : > { %v909_v53 = vand.u32 3, %v908_v12  ;;  %vm1330_vm10 = vcmp.eq.s32.totalorder %v1325_v54, 2  ;;  %vm1327_vm12 = vcmp.eq.s32.totalorder %v1325_v54, 0  ;;  %vm1326_vm15 = vcmp.lt.s32.totalorder %v1325_v54, 2  ;;  %v1503_v12 = vld [vmem:[%s2764_s6 + $0x18] sm:$0xff] }
 0x10f   : > { %v898_v49 = vmul.f32 %v897_v44, %v895_v47  ;;  %v1921_v3 = vpack.c.bf16 %v814_v48, %v2590_v1  ;;  %v1925_v6 = vpack.c.bf16 %v1231_v59, %v2594_v22  ;;  %vm1383_vm14 = vcmask 293888   ;;  %v1346_v1 = vld [vmem:[%s2762_s4 + $0x8] sm:$0xff]  ;;  %v1347_v22 = vld [vmem:[%s2762_s4 + $0x10] sm:$0xff] }
 0x110   : > { %vm914_vm9 = vcmp.eq.s32.totalorder %v909_v53, 2  ;;  %vm911_vm11 = vcmp.eq.s32.totalorder %v909_v53, 0  ;;  %vm910_vm13 = vcmp.lt.s32.totalorder %v909_v53, 2  ;;  %vm1743_vm0 = vcmp.lt.s32.totalorder %v443_v17, 256 }
 0x111   : > { %v899_v4 = vxor.u32 2147483648, %v898_v49 }
 0x113   : > { %v900_v23 = vsel %vm817_vm7, %v899_v4, %v898_v49 }
 0x114   : > { %v903_v61 = vsel %vm816_vm8, %v2396_v52, %v900_v23  ;;  %v1357_v52 = vld [vmem:[#allocation2 + $0x40] sm:$0xf] }
 0x115   : > { %2038 = vcosq.f32 %v903_v61 }
 0x116   : > { %2040 = vsinq.f32 %v903_v61  ;;  %v1501_v61 = vld [vmem:[%s2764_s6 + $0x8] sm:$0xff] }
 0x11f   : > { %v2039_v57 = vpop.eup %2038 }
 0x120   : > { %v2041_v55 = vpop.eup %2040  ;;  %v915_v58 = vxor.u32 2147483648, %v2039_v57 }
 0x121   : > { %v912_v43 = vxor.u32 2147483648, %v2041_v55 }
 0x122   : > { %v916_v5 = vsel %vm914_vm9, %v915_v58, %v2041_v55  ;;  %v1332_v10 = vsel %vm1330_vm10, %v915_v58, %v2041_v55  ;;  %v1516_v58 = vpop.permute.xlu1 %1515 }
 0x123   : > { %v913_v56 = vsel %vm911_vm11, %v2039_v57, %v912_v43  ;;  %v1329_v41 = vsel %vm1327_vm12, %v2039_v57, %v912_v43  ;;  %v1511_v57 = vpop.permute.xlu0 %1510 }
 0x124   : > { %v917_v62 = vsel %vm910_vm13, %v913_v56, %v916_v5  ;;  %v1333_v11 = vsel %vm1326_vm15, %v1329_v41, %v1332_v10 }
 0x125   : > { %v918_v63 = vsel %vm907_vm1, nan, %v917_v62  ;;  %v1334_v29 = vsel %vm907_vm1, nan, %v1333_v11 }
 0x126   : > { %v1919_v8 = vpack.c.bf16 %v918_v63, %v2635_v50  ;;  %v1923_v14 = vpack.c.bf16 %v1334_v29, %v2639_v9  ;;  %v1348_v50 = vld [vmem:[%s2762_s4 + $0x18] sm:$0xff] }
 0x128   : > { %1920 = vmatprep.subr.bf16.mxu0 %v1919_v8 }
 0x129   : > { %1922 = vmatpush1.bf16.msra.mxu0 %v1921_v3 }
 0x12a   : > { %1924 = vmatprep.subr.bf16.mxu0 %v1923_v14 }
 0x12d   : > { %1926 = vmatpush1.bf16.msra.mxu0 %v1925_v6  ;;  %v1521_v6 = vpop.permute.xlu0 %1520 }
 0x12e   : > { %1900 = vmatprep.subr.msk.mxu0 %vm1396_vm2, %v1358_v20 }
 0x131   : > { %1901 = vmatpush1.msk.msra.mxu0 %vm1396_vm2, %v1357_v52  ;;  %v1526_v52 = vpop.permute.xlu1 %1525 }
 0x132   : > { %1902 = vmatmul.mubr.msk.f32.vlgmr.msra.gmra.mrb[0].mxu0 %vm1383_vm14, %v1345_v28 }
 0x133   : > { %1473 = vmatprep.mubr.f32.mxu0 %v2129_v15 }
 0x136   : > { %1903 = vmatmul.mubr.msk.f32.gmra.mrb[2].mxu0 %vm1383_vm14, %v1346_v1 }
 0x137   : > { %1479 = vmatprep.mubr.f32.mxu0 %v2129_v15 }
 0x13a   : > { %1904 = vmatmul.mubr.msk.f32.gmra.mrb[4].mxu0 %vm1383_vm14, %v1347_v22 }
 0x13b   : > { %1485 = vmatprep.mubr.f32.mxu0 %v2129_v15 }
 0x13e   : > { %1905 = vmatmul.mubr.msk.f32.gmra.mrb[6].mxu0 %vm1383_vm14, %v1348_v50 }
 0x205   : > { %v1469_v9 = vpop.f32.mrb[0].mxu0 }
 0x206   : > { %v1471_v2 = vpop.f32.mrb[1].mxu0  ;;  %v1470_v25 = vadd.f32 %v1469_v9, %v1366_v32 }
 0x207   : > { %v1472_v27 = vadd.f32 %v1471_v2, %v1366_v32 }
 0x208   : > { %v1492_v30 = vmax.f32 %v1470_v25, 0.0 }
 0x209   : > { %v1475_v16 = vpop.f32.mrb[2].mxu0  ;;  %v1493_v42 = vmax.f32 %v1472_v27, 0.0 }
 0x20a   : > { %v1476_v26 = vadd.f32 %v1475_v16, %v1371_v40  ;;  %v1477_v0 = vpop.f32.mrb[3].mxu0 }
 0x20b   : > { %v1478_v7 = vadd.f32 %v1477_v0, %v1371_v40  ;;  %v2130_v0 = vmov 1966171168  }
 0x20c   : > { %v1494_v60 = vmax.f32 %v1476_v26, 0.0  ;;  %v1638_v26 = vld [vmem:[%s2766_s8] sm:$0x1] }
 0x20d   : > { %v1495_v31 = vmax.f32 %v1478_v7, 0.0  ;;  %v1481_v45 = vpop.f32.mrb[4].mxu0  ;;  %v1727_v7 = vunpack.c.l.s4 %v2130_v0 }
 0x20e   : > { %v1483_v34 = vpop.f32.mrb[5].mxu0  ;;  %v1929_v35 = vpack.c.bf16 %v1494_v60, %v1492_v30  ;;  %v1482_v36 = vadd.f32 %v1481_v45, %v1376_v37  ;;  %v1643_v30 = vpop.permute.xlu0 %1642 }
 0x20f   : > { %v1927_v38 = vpack.c.bf16 %v1495_v31, %v1493_v42  ;;  %v1484_v13 = vadd.f32 %v1483_v34, %v1376_v37  ;;  %v1728_v60 = vunpack.c.0.s8 %v1727_v7  ;;  %v1648_v42 = vrot.slane %v1643_v30, %v2299_v24 }
 0x210   : > { %v1496_v48 = vmax.f32 %v1482_v36, 0.0 }
 0x211   : > { %v1487_v46 = vpop.f32.mrb[6].mxu0  ;;  %1928 = vmatprep.subr.bf16.mxu1 %v1927_v38  ;;  %v1497_v49 = vmax.f32 %v1484_v13, 0.0  ;;  %v1731_v37 = vsub.s32 %v1728_v60, %v2294_v19 }
 0x212   : > { %v1488_v47 = vadd.f32 %v1487_v46, %v1381_v39  ;;  %v1489_v44 = vpop.f32.mrb[7].mxu0  ;;  %1930 = vmatpush1.bf16.msra.mxu1 %v1929_v35 }
 0x213   : > { %v1490_v33 = vadd.f32 %v1489_v44, %v1381_v39 }
 0x214   : > { %v1498_v59 = vmax.f32 %v1488_v47, 0.0 }
 0x215   : > { %v1499_v18 = vmax.f32 %v1490_v33, 0.0 }
 0x216   : > { %v1933_v4 = vpack.c.bf16 %v1498_v59, %v1496_v48 }
 0x217   : > { %v1931_v23 = vpack.c.bf16 %v1499_v18, %v1497_v49 }
 0x219   : > { %1932 = vmatprep.subr.bf16.mxu1 %v1931_v23 }
 0x21a   : > { %1934 = vmatpush1.bf16.msra.mxu1 %v1933_v4 }
 0x21d   : > { %1906 = vmatmul.mubr.msk.f32.vlgmr.msra.gmra.mrb[0].mxu1 %vm1528_vm3, %v1500_v21 }
 0x21e   : > { %1611 = vmatprep.mubr.f32.mxu1 %v2129_v15 }
 0x221   : > { %1907 = vmatmul.mubr.msk.f32.gmra.mrb[2].mxu1 %vm1528_vm3, %v1501_v61 }
 0x222   : > { %1617 = vmatprep.mubr.f32.mxu1 %v2129_v15 }
 0x225   : > { %1908 = vmatmul.mubr.msk.f32.gmra.mrb[4].mxu1 %vm1528_vm3, %v1502_v51 }
 0x226   : > { %1623 = vmatprep.mubr.f32.mxu1 %v2129_v15 }
 0x229   : > { %1909 = vmatmul.mubr.msk.f32.gmra.mrb[6].mxu1 %vm1528_vm3, %v1503_v12 }
 0x22a   : > { %1716 = vmatprep.mubr.f32.mxu1 %v2129_v15 }
 0x2f0   : > { %v1607_v53 = vpop.f32.mrb[0].mxu1 }
 0x2f1   : > { %v1609_v54 = vpop.f32.mrb[1].mxu1  ;;  %v1608_v55 = vadd.f32 %v1607_v53, %v1511_v57 }
 0x2f2   : > { %v1610_v43 = vadd.f32 %v1609_v54, %v1511_v57 }
 0x2f3   : > { %v1630_v62 = vmax.f32 %v1608_v55, 0.0 }
 0x2f4   : > { %v1613_v5 = vpop.f32.mrb[2].mxu1  ;;  %v1631_v63 = vmax.f32 %v1610_v43, 0.0 }
 0x2f5   : > { %v1614_v10 = vadd.f32 %v1613_v5, %v1516_v58  ;;  %v1615_v56 = vpop.f32.mrb[3].mxu1 }
 0x2f6   : > { %v1616_v41 = vadd.f32 %v1615_v56, %v1516_v58 }
 0x2f7   : > { %v1632_v11 = vmax.f32 %v1614_v10, 0.0 }
 0x2f8   : > { %v1633_v29 = vmax.f32 %v1616_v41, 0.0  ;;  %v1619_v3 = vpop.f32.mrb[4].mxu1 }
 0x2f9   : > { %v1937_v8 = vpack.c.bf16 %v1632_v11, %v1630_v62  ;;  %v1621_v14 = vpop.f32.mrb[5].mxu1  ;;  %v1620_v15 = vadd.f32 %v1619_v3, %v1521_v6 }
 0x2fa   : > { %v1935_v20 = vpack.c.bf16 %v1633_v29, %v1631_v63  ;;  %v1622_v28 = vadd.f32 %v1621_v14, %v1521_v6 }
 0x2fb   : > { %v1634_v2 = vmax.f32 %v1620_v15, 0.0 }
 0x2fc   : > { %v1625_v1 = vpop.f32.mrb[6].mxu1  ;;  %1936 = vmatprep.subr.bf16.mxu1 %v1935_v20  ;;  %v1635_v25 = vmax.f32 %v1622_v28, 0.0 }
 0x2fd   : > { %v1626_v22 = vadd.f32 %v1625_v1, %v1526_v52  ;;  %v1627_v50 = vpop.f32.mrb[7].mxu1  ;;  %1938 = vmatpush1.bf16.msra.mxu1 %v1937_v8 }
 0x2fe   : > { %v1628_v9 = vadd.f32 %v1627_v50, %v1526_v52 }
 0x2ff   : > { %v1636_v32 = vmax.f32 %v1626_v22, 0.0 }
 0x300   : > { %v1637_v40 = vmax.f32 %v1628_v9, 0.0 }
 0x301   : > { %v1941_v27 = vpack.c.bf16 %v1636_v32, %v1634_v2 }
 0x302   : > { %v1939_v16 = vpack.c.bf16 %v1637_v40, %v1635_v25 }
 0x304   : > { %1940 = vmatprep.subr.bf16.mxu1 %v1939_v16 }
 0x305   : > { %1942 = vmatpush1.bf16.msra.mxu1 %v1941_v27 }
 0x308   : > { %1910 = vmatmul.mubr.msk.f32.vlgmr.msra.gmra.mrb[8].mxu1 %vm1528_vm3, %v1638_v26 }
 0x3db   : > { %v1718_v31 = vpop.f32.mrb[8].mxu1 }
 0x3dc   : > { %v1719_v45 = vadd.f32 %v1718_v31, %v1648_v42  ;;  %v1720_v34 = vpop.f32.mrb[9].mxu1 }
 0x3dd   : > { %v1721_v35 = vadd.f32 %v1720_v34, %v1648_v42 }
 0x3df   : > { %v1725_v38 = vcombine.low %v1719_v45, %v1721_v35 }
 0x3e1   : > { %v1732_v36 = vrot.slane %v1725_v38, %v1731_v37 }
 0x3e3   : > { %v1739_v39 = vrot.slane %v1732_v36, %v1731_v37 }
 0x3e5   : > { %1745 = vst.msk [vmem:[%s405_s21] sm:$0x3] %vm1743_vm0, %v1739_v39 }
 0x3e6   : > { %2055 = shalt.err (!%p2052_p5)
}
 0x3e7   : > { %s2056_s13 = scalar_lea.hbm %s2711_s28, 32  ;;  %s2060_s21 = scalar_lea.hbm %s2768_s10, 64 }
 0x3e8   : > { %p2057_p6 = scmp.ne.s32.totalorder %s2711_s28, %s2056_s13  ;;  %p2061_p10 = scmp.lt.u32.totalorder %s2711_s28, %s2768_s10 }
 0x3e9   : > { %p2062_p11 = scmp.lt.u32.totalorder %s2060_s21, %s2056_s13  ;;  %p2064_p13 = scmp.lt.u32.totalorder %s2056_s13, %s2711_s28 }
 0x3ea   : > { %p2058_p7 = pnand %p2057_p6, %p2230_p4 }
 0x3eb   : > { %p2063_p12 = por %p2062_p11, %p2061_p10 }
 0x3ec   : > { %p2059_p9 = pneg %p2058_p7 }
 0x3ed   : > { %p2065_p0 = por %p2064_p13, %p2063_p12 }
 0x3ef   : > { %p2066_p1 = pnand %p2065_p0, %p2059_p9 }
 0x3f1   : > { %2069 = shalt.err (!%p2066_p1)
}
 0x3f2   : > { %1959 = dma.vmem_to_hbm [thread:$0]  (%p2230_p4), %s2713_s23, 32, %s2711_s28, %s1747_s22  }
 0x3f3 PF: > { %p1965_p2 = scmp.ge.s32.totalorder %s2120_s20, 2  ;;  %s1775_s29 = sand.u32 1, %s2100_s15  }
 0x3f4   : > { %s1776_s18 = scalar_lea.sflag [#allocation5], %s1775_s29 }
 0x3f5   : > { %p1962_p3 = pnand %p1965_p2, %p2237_p8 }
 0x3f7   : > { %2095 = dma.done.wait (!%p1962_p3), %s1776_s18, 32  }
 0x3f8   : > { %2097 = vsyncadd (!%p1962_p3), %s1776_s18, 4294967264  ;;  %s25_s20 = sadd.s32 1, %s2120_s20   ;;  %s2777_s24 = sld [smem:[#allocation7_spill]] }
 0x3f9   : > { %p22_p5 = scmp.ge.s32.totalorder %s25_s20, 4   ;;  %s2778_s15 = smov %s2104_s16 }
 0x3fa   : > { %s2779_s16 = smov %s2108_s17  ;;  %s2780_s17 = smov %s2243_s27 }
 0x3fb   : > { %s2781_s18 = smov %s2116_s19  ;;  %24 = sbr.rel (!%p22_p5) target bundleno = 7 (0x7), region = 98 }
 0x3fe   : > { %s2782_s19 = smov %s2777_s24 }
 0x402   :  { %1781 = vsyncpa [#allocation5], 1 }
 0x403   :  { %1783 = vsyncpa [#allocation5 + $0x1], 1 }

</bundles_post_ra>
